<compile_context>
chip_gen: v5e
topology: v5e:2x2
jax: 0.10.0
libtpu: 0.0.40
codegen_flags: <defaults>
</compile_context>

<pallas_src>
import functools

import jax
import jax.numpy as jnp
from jax.experimental import pallas as pl
from jax.experimental.pallas import tpu as pltpu

INPUT_SIZE = 20
HIDDEN = 10          # layers = [10]
OUTPUT_SIZE = 5      # output_size chosen for this instantiation

TB_MAX = 32768       # max batch tile (lane axis); multiple of 256
TB_MIN = 256
MIN_STEPS = 4        # target >=4 grid steps so v7x's 2 TCs both get work


def _round_up(x, m):
    return (x + m - 1) // m * m


def _pick_batch_tile(batch):
    """Largest lane-dense tile that still yields >=MIN_STEPS grid steps."""
    tb = _round_up(pl.cdiv(batch, MIN_STEPS), 256)
    return max(TB_MIN, min(TB_MAX, tb))


def mlp_logsoftmax_kernel(x_ref, w1_ref, b1_ref, w2_ref, b2_ref, o_ref):
    # Batch sits on the lane (last) axis.  Weights are in PyTorch (out, in)
    # layout, so the transposed formulation is h^T = W1 @ x^T, logits^T = W2 @ h^T.
    cdt = x_ref.dtype                                   # matmul transfer dtype (f32 or bf16)

    xT = x_ref[...]                                     # (INPUT_SIZE, tb)

    # Hidden layer: Linear(20 -> 10) + ReLU  (bias add / ReLU in f32)
    h = jnp.dot(w1_ref[...], xT, preferred_element_type=jnp.float32)   # (HIDDEN, tb)
    h = jnp.maximum(h + b1_ref[...], 0.0)

    # Output layer: Linear(10 -> OUTPUT_SIZE)
    logits = jnp.dot(w2_ref[...], h.astype(cdt),
                     preferred_element_type=jnp.float32)                # (OUT, tb)
    logits = logits + b2_ref[...]

    # LogSoftmax over the feature axis (== PyTorch dim=1), numerically stable, f32.
    m = jnp.max(logits, axis=0, keepdims=True)
    shifted = logits - m
    lse = jnp.log(jnp.sum(jnp.exp(shifted), axis=0, keepdims=True))
    o_ref[...] = (shifted - lse).astype(o_ref.dtype)


@functools.partial(jax.jit,
                   static_argnames=("transfer_dtype", "feature_major_io", "tb"))
def torch_net_forward(x, w1, b1, w2, b2, *,
                      transfer_dtype=jnp.bfloat16,
                      feature_major_io=False,
                      tb=None):
    """Fused forward pass of torch_net.

    Default (PyTorch-compatible) I/O:
        x: (B, INPUT_SIZE)  ->  returns (B, OUTPUT_SIZE) f32 log-probs.
    feature_major_io=True (zero wrapper copies, for layout-aware callers):
        x: (INPUT_SIZE, B) used as-is  ->  returns (OUTPUT_SIZE, B) f32 log-probs.

    w1: (HIDDEN, INPUT_SIZE), b1: (HIDDEN, 1),
    w2: (OUTPUT_SIZE, HIDDEN), b2: (OUTPUT_SIZE, 1)   (PyTorch nn.Linear layout).
    """
    if feature_major_io:
        # Caller already provides (feature, batch) layout; use its dtype as the
        # transfer dtype so the wrapper performs no HBM copies at all.
        xT = x
    else:
        xT = x.T                                        # single fused transpose (+cast)
        if transfer_dtype is not None and xT.dtype != transfer_dtype:
            xT = xT.astype(transfer_dtype)

    B = xT.shape[1]
    if tb is None:
        tb = _pick_batch_tile(B)

    cdt = xT.dtype
    w1c = w1.astype(cdt)
    w2c = w2.astype(cdt)

    itm_in = jnp.dtype(cdt).itemsize
    # Double-buffered VMEM footprint of the streamed tiles (sublane-padded),
    # plus slack for the resident weights / biases / internal scratch.
    in_tile_bytes = _round_up(INPUT_SIZE, 32) * tb * itm_in
    out_tile_bytes = _round_up(OUTPUT_SIZE, 8) * tb * 4
    vmem_limit = int(max(16 << 20, 2 * (in_tile_bytes + out_tile_bytes) + (4 << 20)))

    cost = pl.CostEstimate(
        flops=2 * B * (INPUT_SIZE * HIDDEN + HIDDEN * OUTPUT_SIZE),
        transcendentals=B * (OUTPUT_SIZE + 1),
        bytes_accessed=(B * INPUT_SIZE * itm_in
                        + B * OUTPUT_SIZE * 4
                        + (INPUT_SIZE * HIDDEN + HIDDEN * OUTPUT_SIZE) * itm_in
                        + (HIDDEN + OUTPUT_SIZE) * 4),
    )

    outT = pl.pallas_call(
        mlp_logsoftmax_kernel,
        out_shape=jax.ShapeDtypeStruct((OUTPUT_SIZE, B), jnp.float32),
        grid=(pl.cdiv(B, tb),),                         # ragged last tile is masked
        in_specs=[
            pl.BlockSpec((INPUT_SIZE, tb), lambda i: (0, i)),        # x^T tile (streamed)
            pl.BlockSpec((HIDDEN, INPUT_SIZE), lambda i: (0, 0)),    # w1 (VMEM-resident)
            pl.BlockSpec((HIDDEN, 1), lambda i: (0, 0)),             # b1 (resident)
            pl.BlockSpec((OUTPUT_SIZE, HIDDEN), lambda i: (0, 0)),   # w2 (resident)
            pl.BlockSpec((OUTPUT_SIZE, 1), lambda i: (0, 0)),        # b2 (resident)
        ],
        out_specs=pl.BlockSpec((OUTPUT_SIZE, tb), lambda i: (0, i)),  # lane-dense store
        compiler_params=pltpu.CompilerParams(
            dimension_semantics=("parallel",),          # batch axis shards across TCs (v7x)
            vmem_limit_bytes=vmem_limit),
        cost_estimate=cost,
    )(xT, w1c, b1, w2c, b2)

    if feature_major_io:
        return outT                                     # (OUTPUT_SIZE, B), no wrapper copy
    return outT.T                                       # (B, OUTPUT_SIZE)


def init_params(key):
    """nn.Linear-style init (uniform +/- 1/sqrt(fan_in)), PyTorch (out, in) layout."""
    k1, k2, k3, k4 = jax.random.split(key, 4)
    bound1 = 1.0 / jnp.sqrt(INPUT_SIZE)
    bound2 = 1.0 / jnp.sqrt(HIDDEN)
    w1 = jax.random.uniform(k1, (HIDDEN, INPUT_SIZE), jnp.float32, -bound1, bound1)
    b1 = jax.random.uniform(k2, (HIDDEN, 1), jnp.float32, -bound1, bound1)
    w2 = jax.random.uniform(k3, (OUTPUT_SIZE, HIDDEN), jnp.float32, -bound2, bound2)
    b2 = jax.random.uniform(k4, (OUTPUT_SIZE, 1), jnp.float32, -bound2, bound2)
    return w1, b1, w2, b2


def reference_forward(x, w1, b1, w2, b2):
    h = jnp.maximum(x @ w1.T + b1[:, 0], 0.0)
    logits = h @ w2.T + b2[:, 0]
    return jax.nn.log_softmax(logits, axis=1)


if __name__ == "__main__":
    key = jax.random.PRNGKey(0)
    kx, kx2, kp = jax.random.split(key, 3)
    w1, b1, w2, b2 = init_params(kp)

    # --- tiny batch (single ragged tile) ---------------------------------
    batch = 8
    x = jax.random.normal(kx, (batch, INPUT_SIZE), jnp.float32)
    ref = reference_forward(x, w1, b1, w2, b2)

    # f32 transfer path — exact match to the PyTorch forward.
    out_f32 = jax.block_until_ready(
        torch_net_forward(x, w1, b1, w2, b2, transfer_dtype=jnp.float32))
    assert out_f32.shape == (batch, OUTPUT_SIZE)
    assert jnp.allclose(out_f32, ref, atol=1e-5, rtol=1e-5)

    # Default bf16 transfer path (v6e/v7x bandwidth lever; all math stays f32).
    out_bf16 = jax.block_until_ready(torch_net_forward(x, w1, b1, w2, b2))
    assert out_bf16.shape == (batch, OUTPUT_SIZE)
    assert jnp.allclose(out_bf16, ref, atol=5e-2, rtol=5e-2)

    # --- larger batch: multi-step grid + ragged last block ---------------
    batch2 = 1000
    x2 = jax.random.normal(kx2, (batch2, INPUT_SIZE), jnp.float32)
    ref2 = reference_forward(x2, w1, b1, w2, b2)

    out2 = jax.block_until_ready(
        torch_net_forward(x2, w1, b1, w2, b2, transfer_dtype=jnp.float32))
    assert out2.shape == (batch2, OUTPUT_SIZE)
    assert jnp.allclose(out2, ref2, atol=1e-5, rtol=1e-5)   # confirms masked ragged writeback

    # Zero-copy feature-major I/O path (what a layout-aware caller would use).
    outT = jax.block_until_ready(
        torch_net_forward(x2.T, w1, b1, w2, b2, feature_major_io=True))
    assert outT.shape == (OUTPUT_SIZE, batch2)
    assert jnp.allclose(outT.T, ref2, atol=1e-5, rtol=1e-5)

    print("KERNEL_OK")
</pallas_src>

<mosaic_0001>
module attributes {stable_mosaic.version = 11 : i64} {
  func.func @mlp_logsoftmax_kernel(%arg0: i32, %arg1: memref<20x256xf32, #tpu.memory_space<vmem>>, %arg2: memref<10x20xf32, #tpu.memory_space<vmem>>, %arg3: memref<10x1xf32, #tpu.memory_space<vmem>>, %arg4: memref<5x10xf32, #tpu.memory_space<vmem>>, %arg5: memref<5x1xf32, #tpu.memory_space<vmem>>, %arg6: memref<5x256xf32, #tpu.memory_space<vmem>>) attributes {dimension_semantics = [#tpu.dimension_semantics<parallel>], iteration_bounds = array<i64: 1>, scalar_prefetch = 0 : i64, scratch_operands = 0 : i64, tpu.core_type = #tpu.core_type<tc>, window_params = [{transform_indices = @transform_0, window_bounds = array<i64: 20, 256>}, {pipeline_mode = #tpu.pipeline_mode<synchronous>, transform_indices = @transform_1, window_bounds = array<i64: 10, 20>}, {pipeline_mode = #tpu.pipeline_mode<synchronous>, transform_indices = @transform_2, window_bounds = array<i64: 10, 1>}, {pipeline_mode = #tpu.pipeline_mode<synchronous>, transform_indices = @transform_3, window_bounds = array<i64: 5, 10>}, {pipeline_mode = #tpu.pipeline_mode<synchronous>, transform_indices = @transform_4, window_bounds = array<i64: 5, 1>}, {transform_indices = @transform_5, window_bounds = array<i64: 5, 256>}]} {
    %c0 = arith.constant 0 : index
    %c0_0 = arith.constant 0 : index
    %0 = vector.load %arg1[%c0, %c0_0] : memref<20x256xf32, #tpu.memory_space<vmem>>, vector<20x256xf32>
    %c0_1 = arith.constant 0 : index
    %c0_2 = arith.constant 0 : index
    %1 = vector.load %arg2[%c0_1, %c0_2] : memref<10x20xf32, #tpu.memory_space<vmem>>, vector<10x20xf32>
    %cst = arith.constant dense<0.000000e+00> : vector<10x256xf32>
    %2 = tpu.matmul %1, %0, %cst {dimension_numbers = #tpu.dot_dimension_numbers<[1], [0], [0], [1], [0, 0, 1, 1], [], []>} : vector<10x20xf32>, vector<20x256xf32>, vector<10x256xf32> -> vector<10x256xf32>
    %c0_3 = arith.constant 0 : index
    %c0_4 = arith.constant 0 : index
    %3 = vector.load %arg3[%c0_3, %c0_4] : memref<10x1xf32, #tpu.memory_space<vmem>>, vector<10x1xf32>
    %4 = vector.broadcast %3 : vector<10x1xf32> to vector<10x256xf32>
    %5 = arith.addf %2, %4 : vector<10x256xf32>
    %cst_5 = arith.constant 0.000000e+00 : f32
    %6 = vector.broadcast %cst_5 : f32 to vector<10x256xf32>
    %7 = arith.maximumf %5, %6 : vector<10x256xf32>
    %c0_6 = arith.constant 0 : index
    %c0_7 = arith.constant 0 : index
    %8 = vector.load %arg4[%c0_6, %c0_7] : memref<5x10xf32, #tpu.memory_space<vmem>>, vector<5x10xf32>
    %cst_8 = arith.constant dense<0.000000e+00> : vector<5x256xf32>
    %9 = tpu.matmul %8, %7, %cst_8 {dimension_numbers = #tpu.dot_dimension_numbers<[1], [0], [0], [1], [0, 0, 1, 1], [], []>} : vector<5x10xf32>, vector<10x256xf32>, vector<5x256xf32> -> vector<5x256xf32>
    %c0_9 = arith.constant 0 : index
    %c0_10 = arith.constant 0 : index
    %10 = vector.load %arg5[%c0_9, %c0_10] : memref<5x1xf32, #tpu.memory_space<vmem>>, vector<5x1xf32>
    %11 = vector.broadcast %10 : vector<5x1xf32> to vector<5x256xf32>
    %12 = arith.addf %9, %11 : vector<5x256xf32>
    %cst_11 = arith.constant dense<0xFF800000> : vector<256xf32>
    %13 = vector.multi_reduction <maximumf>, %12, %cst_11 [0] : vector<5x256xf32> to vector<256xf32>
    %14 = vector.shape_cast %13 : vector<256xf32> to vector<1x256xf32>
    %15 = vector.broadcast %14 : vector<1x256xf32> to vector<5x256xf32>
    %16 = arith.subf %12, %15 : vector<5x256xf32>
    %17 = math.exp %16 : vector<5x256xf32>
    %cst_12 = arith.constant dense<0.000000e+00> : vector<256xf32>
    %18 = vector.multi_reduction <add>, %17, %cst_12 [0] : vector<5x256xf32> to vector<256xf32>
    %19 = vector.shape_cast %18 : vector<256xf32> to vector<1x256xf32>
    %20 = math.log %19 : vector<1x256xf32>
    %21 = vector.broadcast %20 : vector<1x256xf32> to vector<5x256xf32>
    %22 = arith.subf %16, %21 : vector<5x256xf32>
    %c0_13 = arith.constant 0 : index
    %c0_14 = arith.constant 0 : index
    %23 = vector.load %arg6[%c0_13, %c0_14] : memref<5x256xf32, #tpu.memory_space<vmem>>, vector<5x256xf32>
    tpu.vector_store %arg6[%c0_13, %c0_14], %22 {strides = array<i32>} : memref<5x256xf32, #tpu.memory_space<vmem>>, vector<5x256xf32>,
    return
  }
  func.func @transform_0(%arg0: i32) -> (i32, i32) {
    %c0_i32 = arith.constant 0 : i32
    %c0_i32_0 = arith.constant 0 : i32
    return %c0_i32, %arg0 : i32, i32
  }
  func.func @transform_1(%arg0: i32) -> (i32, i32) {
    %c0_i32 = arith.constant 0 : i32
    %c0_i32_0 = arith.constant 0 : i32
    %c0_i32_1 = arith.constant 0 : i32
    return %c0_i32, %c0_i32_0 : i32, i32
  }
  func.func @transform_2(%arg0: i32) -> (i32, i32) {
    %c0_i32 = arith.constant 0 : i32
    %c0_i32_0 = arith.constant 0 : i32
    %c0_i32_1 = arith.constant 0 : i32
    return %c0_i32, %c0_i32_0 : i32, i32
  }
  func.func @transform_3(%arg0: i32) -> (i32, i32) {
    %c0_i32 = arith.constant 0 : i32
    %c0_i32_0 = arith.constant 0 : i32
    %c0_i32_1 = arith.constant 0 : i32
    return %c0_i32, %c0_i32_0 : i32, i32
  }
  func.func @transform_4(%arg0: i32) -> (i32, i32) {
    %c0_i32 = arith.constant 0 : i32
    %c0_i32_0 = arith.constant 0 : i32
    %c0_i32_1 = arith.constant 0 : i32
    return %c0_i32, %c0_i32_0 : i32, i32
  }
  func.func @transform_5(%arg0: i32) -> (i32, i32) {
    %c0_i32 = arith.constant 0 : i32
    %c0_i32_0 = arith.constant 0 : i32
    return %c0_i32, %arg0 : i32, i32
  }
}

</mosaic_0001>

<bundles_post_ra>
// kernel: torch_net_forward.1
= control target key start
LH: loop header
LB: loop body
LE: loop exit
PB: predicated region body
PF: predicated region fallthrough
CT: control target
= control target key end

     0   :  { %v68_v0 = vld [vmem:[#allocation2 + $0x18] sm:$0xf]  ;;  %vm90_vm0 = vcmask 1043456   ;;  %v66_v1 = vld [vmem:[#allocation2 + $0x8] sm:$0xff]  ;;  %v64_v3 = vld [vmem:[#allocation2] sm:$0xff]  ;;  %v314_v5 = vmov 0   ;;  %s381_s0 = inlined_call_operand.vmem [shape: f32[20,8], index: 0, kind: input, shape index: {}]   ;;  %s382_s1 = inlined_call_operand.vmem [shape: f32[10,20], index: 1, kind: input, shape index: {}]   ;;  %s383_s2 = inlined_call_operand.vmem [shape: f32[10,1], index: 2, kind: input, shape index: {}]   ;;  %s384_s3 = inlined_call_operand.vmem [shape: f32[5,10], index: 3, kind: input, shape index: {}]   ;;  %s385_s4 = inlined_call_operand.vmem [shape: f32[5,1], index: 4, kind: input, shape index: {}]   ;;  %s386_s5 = inlined_call_operand.vmem [shape: f32[5,8], index: 5, kind: output, shape index: {}]  }
   0x1   :  { %296 = vmatpush.msk.msra.mxu1 %vm90_vm0, %v68_v0  ;;  %v48_v2 = vld [vmem:[%s381_s0 + $0x10] sm:$0xff]  ;;  %v46_v4 = vld [vmem:[%s381_s0 + $0x8] sm:$0xff]  ;;  %304 = vset.pattern.permute.xlu0 %v314_v5  ;;  %v69_v7 = vld [vmem:[%s382_s1] sm:$0xff]  ;;  %vm83_vm1 = vcmask 162816   ;;  %vm158_vm2 = vcmask 1041408   ;;  %vm154_vm3 = vcmask 80896  }
   0x2   :  { %49 = vst [vmem:[#allocation2 + $0x10] sm:$0xff] %v48_v2  ;;  %v72_v6 = vld [vmem:[%s383_s2 + $0x8] sm:$0x3]  ;;  %305 = vset.pattern.permute.xlu1 %v314_v5  ;;  %v44_v8 = vld [vmem:[%s381_s0] sm:$0xff]  ;;  %vm205_vm4 = vcmask 1044480  }
   0x3   :  { %134 = vmatpush.msra.mxu1 %v66_v1  ;;  %80 = vperm.xlu0 %304, %v72_v6   ;;  %v71_v9 = vld [vmem:[%s383_s2] sm:$0xff]  ;;  %v70_v11 = vld [vmem:[%s382_s1 + $0x8] sm:$0x3] }
   0x4   :  { %v148_v12 = vld [vmem:[%s385_s4] sm:$0x1f] }
   0x5   :  { %135 = vmatpush.msra.mxu1 %v64_v3  ;;  %151 = vperm.xlu1 %305, %v148_v12   ;;  %v147_v22 = vld [vmem:[%s384_s3] sm:$0x1f] }
   0x6   :  { %297 = vmatmul.msk.f32.vlgmr.msra.gmra.mxu1 %vm83_vm1, %v69_v7 }
   0x9   :  { %v67_v10 = vld [vmem:[#allocation2 + $0x10] sm:$0xf] }
   0xa   :  { %293 = vmatpush.msk.msra.mxu0 %vm90_vm0, %v67_v10 }
   0xb   :  { %75 = vperm.xlu0 %304, %v71_v9  }
   0xc   :  { %111 = vmatpush.msra.mxu0 %v46_v4 }
   0xe   :  { %112 = vmatpush.msra.mxu0 %v44_v8  ;;  %298 = vmatmul.msk.f32.gmra.mxu1 %vm83_vm1, %v70_v11 }
   0xf   :  { %294 = vmatmul.msk.f32.vlgmr.msra.gmra.mxu0 %vm83_vm1, %v69_v7 }
  0x17   :  { %295 = vmatmul.msk.f32.gmra.mxu0 %vm83_vm1, %v70_v11 }
  0x75   :  { %v81_v13 = vpop.permute.xlu0 %80 }
  0x77   :  { %v152_v28 = vpop.permute.xlu1 %151 }
  0x7d   :  { %v76_v15 = vpop.permute.xlu0 %75 }
  0x83   :  { %v137_v14 = vpop.f32.mrf.mxu1 }
  0x84   :  { %v138_v16 = vadd.f32 %v137_v14, %v76_v15 }
  0x86   :  { %v144_v20 = vmax.f32 %v138_v16, 0.0 }
  0x8b   :  { %v140_v17 = vpop.f32.mrf.mxu1 }
  0x8c   :  { %v114_v18 = vpop.f32.mrf.mxu0  ;;  %v141_v19 = vadd.f32 %v140_v17, %v81_v13 }
  0x8d   :  { %v115_v24 = vadd.f32 %v114_v18, %v76_v15 }
  0x8e   :  { %v146_v21 = vmax.f32 %v141_v19, 0.0 }
  0x8f   :  { %v143_v27 = vmax.f32 %v115_v24, 0.0 }
  0x90   :  { %301 = vmatpush.msk.msra.mxu3 %vm158_vm2, %v146_v21 }
  0x92   :  { %200 = vmatpush.msra.mxu3 %v144_v20 }
  0x93   :  { %302 = vmatmul.msk.f32.vlgmr.msra.gmra.mxu3 %vm154_vm3, %v147_v22 }
  0x94   :  { %v117_v23 = vpop.f32.mrf.mxu0 }
  0x95   :  { %v118_v25 = vadd.f32 %v117_v23, %v81_v13 }
  0x97   :  { %v145_v26 = vmax.f32 %v118_v25, 0.0 }
  0x99   :  { %299 = vmatpush.msk.msra.mxu2 %vm158_vm2, %v145_v26 }
  0x9b   :  { %180 = vmatpush.msra.mxu2 %v143_v27 }
  0x9c   :  { %300 = vmatmul.msk.f32.vlgmr.msra.gmra.mxu2 %vm154_vm3, %v147_v22 }
 0x116   :  { %v202_v29 = vpop.f32.mrf.mxu3 }
 0x117   :  { %v203_v30 = vadd.f32 %v202_v29, %v152_v28 }
 0x119   :  { %v213_v31 = vsel %vm205_vm4, %v203_v30, -inf }
 0x11a   :  { %v214_v32 = vrot.slane %v213_v31, 4 }
 0x11c   :  { %v215_v33 = vmax.f32 %v213_v31, %v214_v32 }
 0x11e   :  { %v216_v34 = vrot.slane %v215_v33, 2 }
 0x11f   :  { %v182_v35 = vpop.f32.mrf.mxu2 }
 0x120   :  { %v217_v36 = vmax.f32 %v215_v33, %v216_v34  ;;  %v183_v37 = vadd.f32 %v182_v35, %v152_v28 }
 0x122   :  { %v218_v38 = vrot.slane %v217_v36, 1  ;;  %v206_v39 = vsel %vm205_vm4, %v183_v37, -inf }
 0x123   :  { %v207_v40 = vrot.slane %v206_v39, 4 }
 0x124   :  { %v219_v41 = vmax.f32 %v217_v36, %v218_v38 }
 0x125   :  { %v208_v42 = vmax.f32 %v206_v39, %v207_v40 }
 0x126   :  { %v221_v43 = vsub.f32 %v203_v30, %v219_v41 }
 0x127   :  { %v209_v44 = vrot.slane %v208_v42, 2 }
 0x128   :  { %v224_v45 = vmul.f32 1.442695, %v221_v43 }
 0x129   :  { %v210_v46 = vmax.f32 %v208_v42, %v209_v44 }
 0x12a   :  { %306 = vpow2.f32 %v224_v45 }
 0x12b   :  { %v211_v47 = vrot.slane %v210_v46, 1 }
 0x12d   :  { %v212_v48 = vmax.f32 %v210_v46, %v211_v47 }
 0x12f   :  { %v220_v49 = vsub.f32 %v183_v37, %v212_v48 }
 0x130   :  { %v307_v50 = vpop.eup %306 }
 0x131   :  { %v233_v51 = vsel %vm205_vm4, %v307_v50, 0.0  ;;  %v222_v52 = vmul.f32 1.442695, %v220_v49 }
 0x132   :  { %v234_v53 = vrot.slane %v233_v51, 4 }
 0x133   :  { %308 = vpow2.f32 %v222_v52 }
 0x134   :  { %v235_v54 = vadd.f32 %v234_v53, %v233_v51 }
 0x136   :  { %v236_v55 = vrot.slane %v235_v54, 2 }
 0x138   :  { %v237_v56 = vadd.f32 %v236_v55, %v235_v54 }
 0x139   :  { %v309_v57 = vpop.eup %308 }
 0x13a   :  { %v238_v58 = vrot.slane %v237_v56, 1  ;;  %v226_v59 = vsel %vm205_vm4, %v309_v57, 0.0 }
 0x13b   :  { %v227_v60 = vrot.slane %v226_v59, 4 }
 0x13c   :  { %v239_v61 = vadd.f32 %v238_v58, %v237_v56 }
 0x13d   :  { %v228_v62 = vadd.f32 %v227_v60, %v226_v59 }
 0x13e   :  { %310 = vlog2.f32 %v239_v61 }
 0x13f   :  { %v229_v63 = vrot.slane %v228_v62, 2 }
 0x141   :  { %v230_v0 = vadd.f32 %v229_v63, %v228_v62 }
 0x143   :  { %v231_v1 = vrot.slane %v230_v0, 1 }
 0x144   :  { %v311_v2 = vpop.eup %310 }
 0x145   :  { %v232_v3 = vadd.f32 %v231_v1, %v230_v0 }
 0x147   :  { %312 = vlog2.f32 %v232_v3 }
 0x14d   :  { %v313_v4 = vpop.eup %312 }
 0x14e   :  { %v241_v5 = vmul.f32 0.6931472, %v313_v4 }
 0x150   :  { %v244_v6 = vsub.f32 %v220_v49, %v241_v5 }
 0x152   :  { %246 = vst [vmem:[#allocation3] sm:$0x1f] %v244_v6 }
 0x159   :  { %v278_v7 = vld [vmem:[#allocation3] sm:$0xff] }
 0x15a   :  { %279 = vst [vmem:[%s386_s5] sm:$0xff] %v278_v7 }

</bundles_post_ra>
